<compile_context>
chip_gen: v5e
topology: v5e:2x2
jax: 0.10.0
libtpu: 0.0.40
codegen_flags: <defaults>
</compile_context>

<pallas_src>
import math
import functools

import jax
import jax.numpy as jnp
from jax import lax
from jax.experimental import pallas as pl
from jax.experimental.pallas import tpu as pltpu


_NEG_INF = -1e10  # matches the PyTorch `w*b - 1e10*(1-b)` masking value
_GELU_C = math.sqrt(2.0 / math.pi)


def _hw_params():
    """Generation-aware tile prefs + scoped-VMEM budget (queried at trace time)."""
    vmem_cap = 64 * 1024 * 1024
    try:
        info = pltpu.get_tpu_info()
        vmem_cap = int(getattr(info, "vmem_capacity_bytes", vmem_cap))
    except Exception:
        pass
    if vmem_cap >= 96 * 1024 * 1024:
        # v5e / v6e: 128 MiB physical VMEM -> larger tiles, higher scoped limit.
        return dict(vmem_limit=100 * 1024 * 1024, tm=512, tn=512,
                    tm_head=1024, tq=256, tk=256)
    # v7x: 64 MiB physical VMEM -> tighter scoped budget, 256-shaped MXU tiles.
    return dict(vmem_limit=56 * 1024 * 1024, tm=256, tn=256,
                tm_head=512, tq=256, tk=256)


_HW = _hw_params()


def _pick_tile(dim, pref):
    """Prefer `pref` when it evenly tiles `dim`, else the full dim (always legal)."""
    return pref if (dim >= pref and dim % pref == 0) else dim


def _compiler_params(semantics):
    return pltpu.CompilerParams(
        dimension_semantics=semantics,
        vmem_limit_bytes=_HW["vmem_limit"],
    )


def _cost(flops, bytes_accessed, transcendentals=0):
    return pl.CostEstimate(flops=int(flops), transcendentals=int(transcendentals),
                           bytes_accessed=int(bytes_accessed))


# --------------------------------------------------------------------------
# Fused LayerNorm + Conv1D (x @ W + b), optional fused gelu.
# --------------------------------------------------------------------------
def _ln_linear_kernel(x_ref, g_ref, b_ref, w_ref, bias_ref, o_ref, *, eps, act):
    x = x_ref[...].astype(jnp.float32)                       # (tm, K)
    u = jnp.mean(x, axis=-1, keepdims=True)
    s = jnp.mean(jnp.square(x - u), axis=-1, keepdims=True)
    xn = g_ref[...] * ((x - u) * lax.rsqrt(s + eps)) + b_ref[...]
    y = jnp.dot(xn.astype(jnp.bfloat16), w_ref[...].astype(jnp.bfloat16),
                preferred_element_type=jnp.float32)          # MXU, f32 accum
    y = y + bias_ref[...]
    if act == "gelu":
        y = 0.5 * y * (1.0 + jnp.tanh(_GELU_C * (y + 0.044715 * y * y * y)))
    o_ref[...] = y.astype(o_ref.dtype)


def ln_linear(x, g, b, w, bias, eps, act=None, out_dtype=jnp.float32):
    M, K = x.shape
    N = w.shape[1]
    tm = _pick_tile(M, _HW["tm"])
    tn = _pick_tile(N, _HW["tn"])
    grid = (pl.cdiv(M, tm), pl.cdiv(N, tn))
    bytes_acc = (M * K * x.dtype.itemsize + K * N * w.dtype.itemsize
                 + M * N * jnp.dtype(out_dtype).itemsize)
    return pl.pallas_call(
        functools.partial(_ln_linear_kernel, eps=eps, act=act),
        out_shape=jax.ShapeDtypeStruct((M, N), out_dtype),
        grid_spec=pltpu.PrefetchScalarGridSpec(
            num_scalar_prefetch=0,
            grid=grid,
            in_specs=[
                pl.BlockSpec((tm, K), lambda i, j: (i, 0)),
                pl.BlockSpec((1, K), lambda i, j: (0, 0)),
                pl.BlockSpec((1, K), lambda i, j: (0, 0)),
                pl.BlockSpec((K, tn), lambda i, j: (0, j)),
                pl.BlockSpec((1, tn), lambda i, j: (0, j)),
            ],
            out_specs=pl.BlockSpec((tm, tn), lambda i, j: (i, j)),
        ),
        compiler_params=_compiler_params(("parallel", "parallel")),
        cost_estimate=_cost(2 * M * K * N, bytes_acc,
                            transcendentals=(M * N if act == "gelu" else 0)),
    )(x, g.reshape(1, K), b.reshape(1, K), w, bias.reshape(1, N))


# --------------------------------------------------------------------------
# Conv1D + residual add:  o = res + x @ W + b   (residual stream stays f32)
# --------------------------------------------------------------------------
def _linear_residual_kernel(x_ref, w_ref, bias_ref, res_ref, o_ref):
    y = jnp.dot(x_ref[...].astype(jnp.bfloat16), w_ref[...].astype(jnp.bfloat16),
                preferred_element_type=jnp.float32)
    o_ref[...] = res_ref[...] + y + bias_ref[...]


def linear_residual(x, w, bias, res):
    M, K = x.shape
    N = w.shape[1]
    tm = _pick_tile(M, _HW["tm"])
    tn = _pick_tile(N, _HW["tn"])
    grid = (pl.cdiv(M, tm), pl.cdiv(N, tn))
    bytes_acc = (M * K * x.dtype.itemsize + K * N * w.dtype.itemsize
                 + 2 * M * N * 4)
    return pl.pallas_call(
        _linear_residual_kernel,
        out_shape=jax.ShapeDtypeStruct((M, N), jnp.float32),
        grid_spec=pltpu.PrefetchScalarGridSpec(
            num_scalar_prefetch=0,
            grid=grid,
            in_specs=[
                pl.BlockSpec((tm, K), lambda i, j: (i, 0)),
                pl.BlockSpec((K, tn), lambda i, j: (0, j)),
                pl.BlockSpec((1, tn), lambda i, j: (0, j)),
                pl.BlockSpec((tm, tn), lambda i, j: (i, j)),
            ],
            out_specs=pl.BlockSpec((tm, tn), lambda i, j: (i, j)),
        ),
        compiler_params=_compiler_params(("parallel", "parallel")),
        cost_estimate=_cost(2 * M * K * N, bytes_acc),
    )(x, w, bias.reshape(1, N), res)


# --------------------------------------------------------------------------
# Final LayerNorm fused with the tied lm_head: logits = LN(x) @ wte^T
# wte streamed in bf16, untransposed (contraction over E via dot_general).
# Row tile is large so the vocab matrix is streamed ~once.
# --------------------------------------------------------------------------
def _ln_lm_head_kernel(x_ref, g_ref, b_ref, w_ref, o_ref, *, eps):
    x = x_ref[...].astype(jnp.float32)
    u = jnp.mean(x, axis=-1, keepdims=True)
    s = jnp.mean(jnp.square(x - u), axis=-1, keepdims=True)
    xn = g_ref[...] * ((x - u) * lax.rsqrt(s + eps)) + b_ref[...]
    o_ref[...] = lax.dot_general(
        xn.astype(jnp.bfloat16), w_ref[...].astype(jnp.bfloat16),
        dimension_numbers=(((1,), (1,)), ((), ())),           # contract E of both
        preferred_element_type=jnp.float32)


def ln_lm_head(x, g, b, wte_bf16, eps):
    M, E = x.shape
    V = wte_bf16.shape[0]
    tm = _pick_tile(M, _HW["tm_head"])      # big row tile -> wte streamed ~once
    tn = _pick_tile(V, _HW["tn"])
    grid = (pl.cdiv(M, tm), pl.cdiv(V, tn))
    bytes_acc = M * E * 4 + (M // tm) * V * E * 2 + M * V * 4
    return pl.pallas_call(
        functools.partial(_ln_lm_head_kernel, eps=eps),
        out_shape=jax.ShapeDtypeStruct((M, V), jnp.float32),
        grid_spec=pltpu.PrefetchScalarGridSpec(
            num_scalar_prefetch=0,
            grid=grid,
            in_specs=[
                pl.BlockSpec((tm, E), lambda i, j: (i, 0)),
                pl.BlockSpec((1, E), lambda i, j: (0, 0)),
                pl.BlockSpec((1, E), lambda i, j: (0, 0)),
                pl.BlockSpec((tn, E), lambda i, j: (j, 0)),    # wte untransposed, bf16
            ],
            out_specs=pl.BlockSpec((tm, tn), lambda i, j: (i, j)),
        ),
        compiler_params=_compiler_params(("parallel", "parallel")),
        cost_estimate=_cost(2 * M * E * V, bytes_acc),
    )(x, g.reshape(1, E), b.reshape(1, E), wte_bf16)


# --------------------------------------------------------------------------
# Flash-style causal attention over grid (B*H, q_tiles, kv_tiles).
# k/v index_map clamped at the diagonal -> future kv blocks are not re-DMA'd.
# --------------------------------------------------------------------------
def _flash_attn_kernel(q_ref, k_ref, v_ref, o_ref, m_sc, l_sc, acc_sc,
                       *, scale, tq, tk):
    qi = pl.program_id(1)
    ki = pl.program_id(2)

    @pl.when(ki == 0)
    def _():
        m_sc[...] = jnp.full(m_sc.shape, -jnp.inf, m_sc.dtype)
        l_sc[...] = jnp.zeros(l_sc.shape, l_sc.dtype)
        acc_sc[...] = jnp.zeros(acc_sc.shape, acc_sc.dtype)

    # Skip key blocks entirely in the causal future of this query tile.
    @pl.when(qi * tq + (tq - 1) >= ki * tk)
    def _():
        # scale applied to q (tq x hd) instead of the scores (tq x tk)
        q = (q_ref[...].astype(jnp.float32) * scale).astype(jnp.bfloat16)
        k = k_ref[...].astype(jnp.bfloat16)
        s = lax.dot_general(q, k, (((1,), (1,)), ((), ())),
                            preferred_element_type=jnp.float32)
        q_pos = qi * tq + lax.broadcasted_iota(jnp.int32, (tq, tk), 0)
        k_pos = ki * tk + lax.broadcasted_iota(jnp.int32, (tq, tk), 1)
        s = jnp.where(q_pos >= k_pos, s, _NEG_INF)             # causal mask in-kernel

        m_prev = m_sc[...]
        m_new = jnp.maximum(m_prev, jnp.max(s, axis=-1, keepdims=True))
        alpha = jnp.exp(m_prev - m_new)
        p = jnp.exp(s - m_new)
        l_sc[...] = alpha * l_sc[...] + jnp.sum(p, axis=-1, keepdims=True)
        acc_sc[...] = alpha * acc_sc[...] + jnp.dot(
            p.astype(jnp.bfloat16), v_ref[...].astype(jnp.bfloat16),
            preferred_element_type=jnp.float32)
        m_sc[...] = m_new

    @pl.when(ki == pl.num_programs(2) - 1)
    def _():
        o_ref[...] = (acc_sc[...] * pl.reciprocal(l_sc[...], approx=True)
                      ).astype(o_ref.dtype)


def flash_attention(q, k, v, scale, out_dtype=jnp.bfloat16):
    BH, S, hd = q.shape
    tq = _pick_tile(S, _HW["tq"])
    tk = _pick_tile(S, _HW["tk"])
    grid = (BH, S // tq, S // tk)

    def q_map(b, qi, ki):
        return (b, qi, 0)

    def kv_map(b, qi, ki):
        # Clamp at the diagonal: fully-masked future kv blocks re-use the cached
        # (diagonal) block index, so no DMA is issued for them.
        kmax = ((qi + 1) * tq - 1) // tk
        return (b, jnp.minimum(ki, kmax), 0)

    bytes_acc = 3 * BH * S * hd * q.dtype.itemsize \
        + BH * S * hd * jnp.dtype(out_dtype).itemsize
    return pl.pallas_call(
        functools.partial(_flash_attn_kernel, scale=scale, tq=tq, tk=tk),
        out_shape=jax.ShapeDtypeStruct((BH, S, hd), out_dtype),
        grid_spec=pltpu.PrefetchScalarGridSpec(
            num_scalar_prefetch=0,
            grid=grid,
            in_specs=[
                pl.BlockSpec((None, tq, hd), q_map),
                pl.BlockSpec((None, tk, hd), kv_map),
                pl.BlockSpec((None, tk, hd), kv_map),
            ],
            out_specs=pl.BlockSpec((None, tq, hd), q_map),
            scratch_shapes=[
                pltpu.VMEM((tq, 1), jnp.float32),    # running max m
                pltpu.VMEM((tq, 1), jnp.float32),    # running sum l
                pltpu.VMEM((tq, hd), jnp.float32),   # accumulator
            ],
        ),
        compiler_params=_compiler_params(("parallel", "parallel", "arbitrary")),
        cost_estimate=_cost(4 * BH * S * S * hd, bytes_acc,
                            transcendentals=BH * S * S),
    )(q, k, v)


# ------------------------------ model wrapper ------------------------------

CONFIG = dict(
    vocab_size=64,
    n_positions=16,
    n_ctx=16,
    n_embd=32,
    n_head=4,
    n_layer=2,
    layer_norm_epsilon=1e-5,
)


def init_params(key, cfg):
    E, V, P, L = cfg["n_embd"], cfg["vocab_size"], cfg["n_positions"], cfg["n_layer"]
    keys = iter(jax.random.split(key, 4 + 4 * L))

    def nrm(shape, std=0.02, dtype=jnp.float32):
        return (jax.random.normal(next(keys), shape, jnp.float32) * std).astype(dtype)

    wte = nrm((V, E))                           # f32 master (embedding gather)
    params = {
        "wte": wte,
        "wte_bf16": wte.astype(jnp.bfloat16),   # bf16 copy streamed by lm_head
        "wpe": nrm((P, E)),
        "ln_f_g": jnp.ones((E,), jnp.float32),
        "ln_f_b": jnp.zeros((E,), jnp.float32),
        "layers": [],
    }
    wdt = jnp.bfloat16                          # MXU-native weight storage
    for _ in range(L):
        params["layers"].append({
            "ln1_g": jnp.ones((E,), jnp.float32),
            "ln1_b": jnp.zeros((E,), jnp.float32),
            "c_attn_w": nrm((E, 3 * E), dtype=wdt),
            "c_attn_b": jnp.zeros((3 * E,), jnp.float32),
            "c_proj_w": nrm((E, E), dtype=wdt),
            "c_proj_b": jnp.zeros((E,), jnp.float32),
            "ln2_g": jnp.ones((E,), jnp.float32),
            "ln2_b": jnp.zeros((E,), jnp.float32),
            "c_fc_w": nrm((E, 4 * E), dtype=wdt),
            "c_fc_b": jnp.zeros((4 * E,), jnp.float32),
            "c_mproj_w": nrm((4 * E, E), dtype=wdt),
            "c_mproj_b": jnp.zeros((E,), jnp.float32),
        })
    return params


def gpt2_lm_forward(params, input_ids, cfg):
    B, S = input_ids.shape
    E = cfg["n_embd"]
    H = cfg["n_head"]
    hd = E // H
    eps = cfg["layer_norm_epsilon"]
    scale = 1.0 / math.sqrt(hd)                 # Attention(scale=True)

    # embeddings (gather glue in plain JAX; past=None -> positions 0..S-1)
    pos_ids = jnp.arange(S, dtype=jnp.int32)
    h = (params["wte"][input_ids] + params["wpe"][pos_ids][None, :, :])
    h2 = h.astype(jnp.float32).reshape(B * S, E)                 # residual (f32)

    presents = []
    for lyr in params["layers"]:
        # --- attention branch: LN1 fused into c_attn, qkv emitted in bf16 ---
        qkv = ln_linear(h2, lyr["ln1_g"], lyr["ln1_b"],
                        lyr["c_attn_w"], lyr["c_attn_b"], eps,
                        out_dtype=jnp.bfloat16)                  # (B*S, 3E) bf16
        qkv = qkv.reshape(B, S, 3, H, hd)
        # TODO(synk): replace these XLA split/merge transposes with BlockSpec
        # index maps reading the (B*S,3E) buffer directly (blocked by hd<128).
        q = qkv[:, :, 0].transpose(0, 2, 1, 3).reshape(B * H, S, hd)
        k = qkv[:, :, 1].transpose(0, 2, 1, 3).reshape(B * H, S, hd)
        v = qkv[:, :, 2].transpose(0, 2, 1, 3).reshape(B * H, S, hd)

        k4 = k.reshape(B, H, S, hd)
        v4 = v.reshape(B, H, S, hd)
        presents.append(jnp.stack((k4, v4)).astype(jnp.float32))  # (2,B,H,S,hd) f32

        a = flash_attention(q, k, v, scale)                      # (B*H, S, hd) bf16
        a = a.reshape(B, H, S, hd).transpose(0, 2, 1, 3).reshape(B * S, E)
        # c_proj with fused residual add (residual stays f32)
        h2 = linear_residual(a, lyr["c_proj_w"], lyr["c_proj_b"], h2)

        # --- MLP branch: LN2 fused into c_fc(+gelu) -> bf16 hidden; c_proj+res ---
        m = ln_linear(h2, lyr["ln2_g"], lyr["ln2_b"],
                      lyr["c_fc_w"], lyr["c_fc_b"], eps, act="gelu",
                      out_dtype=jnp.bfloat16)                    # (B*S, 4E) bf16
        h2 = linear_residual(m, lyr["c_mproj_w"], lyr["c_mproj_b"], h2)

    # final LN fused with the tied lm_head (bf16 wte, untransposed, single pass)
    logits = ln_lm_head(h2, params["ln_f_g"], params["ln_f_b"],
                        params["wte_bf16"], eps).reshape(B, S, cfg["vocab_size"])
    return logits, presents


# --------------------------- pure-JAX reference ----------------------------

def _ref_forward(params, input_ids, cfg):
    B, S = input_ids.shape
    E, H = cfg["n_embd"], cfg["n_head"]
    hd = E // H
    eps = cfg["layer_norm_epsilon"]

    def ln(x, g, b):
        u = x.mean(-1, keepdims=True)
        s = ((x - u) ** 2).mean(-1, keepdims=True)
        return g * ((x - u) / jnp.sqrt(s + eps)) + b

    def gelu(x):
        return 0.5 * x * (1 + jnp.tanh(math.sqrt(2 / math.pi) *
                                       (x + 0.044715 * x ** 3)))

    def f32(w):
        return w.astype(jnp.float32)

    pos_ids = jnp.arange(S)
    h = (params["wte"][input_ids] + params["wpe"][pos_ids][None]).astype(jnp.float32)
    mask = jnp.tril(jnp.ones((S, S), jnp.float32))[None, None]
    for lyr in params["layers"]:
        x2 = ln(h, lyr["ln1_g"], lyr["ln1_b"])
        qkv = x2 @ f32(lyr["c_attn_w"]) + lyr["c_attn_b"]
        qh, kh, vh = jnp.split(qkv, 3, axis=2)
        q = qh.reshape(B, S, H, hd).transpose(0, 2, 1, 3)
        k = kh.reshape(B, S, H, hd).transpose(0, 2, 3, 1)
        v = vh.reshape(B, S, H, hd).transpose(0, 2, 1, 3)
        w = jnp.einsum('bhqd,bhdk->bhqk', q, k) / math.sqrt(hd)
        w = w * mask - 1e10 * (1 - mask)
        w = jax.nn.softmax(w, axis=-1)
        a = jnp.einsum('bhqk,bhkd->bhqd', w, v)
        a = a.transpose(0, 2, 1, 3).reshape(B, S, E)
        a = a @ f32(lyr["c_proj_w"]) + lyr["c_proj_b"]
        h = h + a
        x2 = ln(h, lyr["ln2_g"], lyr["ln2_b"])
        m = gelu(x2 @ f32(lyr["c_fc_w"]) + lyr["c_fc_b"])
        m = m @ f32(lyr["c_mproj_w"]) + lyr["c_mproj_b"]
        h = h + m
    h = ln(h, params["ln_f_g"], params["ln_f_b"])
    return h @ params["wte"].T


# ---------------------------------- main -----------------------------------

if __name__ == "__main__":
    key = jax.random.PRNGKey(0)
    pkey, ikey = jax.random.split(key)
    params = init_params(pkey, CONFIG)

    B, S = 2, 8
    input_ids = jax.random.randint(ikey, (B, S), 0, CONFIG["vocab_size"],
                                   dtype=jnp.int32)

    logits, presents = gpt2_lm_forward(params, input_ids, CONFIG)
    logits = jax.block_until_ready(logits)
    presents = [jax.block_until_ready(p) for p in presents]

    # sanity check against pure-JAX reference (bf16 MXU inputs -> loosened tol)
    ref = jax.block_until_ready(_ref_forward(params, input_ids, CONFIG))
    assert logits.shape == (B, S, CONFIG["vocab_size"])
    assert presents[0].shape == (2, B, CONFIG["n_head"], S,
                                 CONFIG["n_embd"] // CONFIG["n_head"])
    assert jnp.allclose(logits, ref, atol=2e-2, rtol=2e-2), "mismatch vs reference"

    print("KERNEL_OK")
</pallas_src>

<mosaic_0001>
module attributes {stable_mosaic.version = 11 : i64} {
  func.func @_ln_linear_kernel(%arg0: i32, %arg1: i32, %arg2: memref<16x32xf32, #tpu.memory_space<vmem>>, %arg3: memref<1x32xf32, #tpu.memory_space<vmem>>, %arg4: memref<1x32xf32, #tpu.memory_space<vmem>>, %arg5: memref<32x96xbf16, #tpu.memory_space<vmem>>, %arg6: memref<1x96xf32, #tpu.memory_space<vmem>>, %arg7: memref<16x96xbf16, #tpu.memory_space<vmem>>) attributes {dimension_semantics = [#tpu.dimension_semantics<parallel>, #tpu.dimension_semantics<parallel>], iteration_bounds = array<i64: 1, 1>, scalar_prefetch = 0 : i64, scratch_operands = 0 : i64, tpu.core_type = #tpu.core_type<tc>, window_params = [{transform_indices = @transform_0, window_bounds = array<i64: 16, 32>}, {pipeline_mode = #tpu.pipeline_mode<synchronous>, transform_indices = @transform_1, window_bounds = array<i64: 1, 32>}, {pipeline_mode = #tpu.pipeline_mode<synchronous>, transform_indices = @transform_2, window_bounds = array<i64: 1, 32>}, {transform_indices = @transform_3, window_bounds = array<i64: 32, 96>}, {transform_indices = @transform_4, window_bounds = array<i64: 1, 96>}, {transform_indices = @transform_5, window_bounds = array<i64: 16, 96>}]} {
    %c0 = arith.constant 0 : index
    %c0_0 = arith.constant 0 : index
    %0 = vector.load %arg2[%c0, %c0_0] : memref<16x32xf32, #tpu.memory_space<vmem>>, vector<16x32xf32>
    %cst = arith.constant dense<0.000000e+00> : vector<16xf32>
    %1 = vector.multi_reduction <add>, %0, %cst [1] : vector<16x32xf32> to vector<16xf32>
    %2 = vector.shape_cast %1 : vector<16xf32> to vector<16x1xf32>
    %cst_1 = arith.constant 3.200000e+01 : f32
    %3 = vector.broadcast %cst_1 : f32 to vector<16x1xf32>
    %4 = arith.divf %2, %3 : vector<16x1xf32>
    %5 = vector.broadcast %4 : vector<16x1xf32> to vector<16x32xf32>
    %6 = arith.subf %0, %5 : vector<16x32xf32>
    %7 = arith.mulf %6, %6 : vector<16x32xf32>
    %cst_2 = arith.constant dense<0.000000e+00> : vector<16xf32>
    %8 = vector.multi_reduction <add>, %7, %cst_2 [1] : vector<16x32xf32> to vector<16xf32>
    %9 = vector.shape_cast %8 : vector<16xf32> to vector<16x1xf32>
    %cst_3 = arith.constant 3.200000e+01 : f32
    %10 = vector.broadcast %cst_3 : f32 to vector<16x1xf32>
    %11 = arith.divf %9, %10 : vector<16x1xf32>
    %c0_4 = arith.constant 0 : index
    %c0_5 = arith.constant 0 : index
    %12 = vector.load %arg3[%c0_4, %c0_5] : memref<1x32xf32, #tpu.memory_space<vmem>>, vector<1x32xf32>
    %13 = vector.broadcast %4 : vector<16x1xf32> to vector<16x32xf32>
    %14 = arith.subf %0, %13 : vector<16x32xf32>
    %cst_6 = arith.constant 9.99999974E-6 : f32
    %15 = vector.broadcast %cst_6 : f32 to vector<16x1xf32>
    %16 = arith.addf %11, %15 : vector<16x1xf32>
    %17 = math.rsqrt %16 : vector<16x1xf32>
    %18 = vector.broadcast %17 : vector<16x1xf32> to vector<16x32xf32>
    %19 = arith.mulf %14, %18 : vector<16x32xf32>
    %20 = vector.broadcast %12 : vector<1x32xf32> to vector<16x32xf32>
    %21 = arith.mulf %20, %19 : vector<16x32xf32>
    %c0_7 = arith.constant 0 : index
    %c0_8 = arith.constant 0 : index
    %22 = vector.load %arg4[%c0_7, %c0_8] : memref<1x32xf32, #tpu.memory_space<vmem>>, vector<1x32xf32>
    %23 = vector.broadcast %22 : vector<1x32xf32> to vector<16x32xf32>
    %24 = arith.addf %21, %23 : vector<16x32xf32>
    %25 = arith.truncf %24 : vector<16x32xf32> to vector<16x32xbf16>
    %c0_9 = arith.constant 0 : index
    %c0_10 = arith.constant 0 : index
    %26 = vector.load %arg5[%c0_9, %c0_10] : memref<32x96xbf16, #tpu.memory_space<vmem>>, vector<32x96xbf16>
    %cst_11 = arith.constant dense<0.000000e+00> : vector<16x96xf32>
    %27 = tpu.matmul %25, %26, %cst_11 {dimension_numbers = #tpu.dot_dimension_numbers<[1], [0], [0], [1], [0, 0, 1, 1], [], []>} : vector<16x32xbf16>, vector<32x96xbf16>, vector<16x96xf32> -> vector<16x96xf32>
    %c0_12 = arith.constant 0 : index
    %c0_13 = arith.constant 0 : index
    %28 = vector.load %arg6[%c0_12, %c0_13] : memref<1x96xf32, #tpu.memory_space<vmem>>, vector<1x96xf32>
    %29 = vector.broadcast %28 : vector<1x96xf32> to vector<16x96xf32>
    %30 = arith.addf %27, %29 : vector<16x96xf32>
    %31 = arith.truncf %30 : vector<16x96xf32> to vector<16x96xbf16>
    %c0_14 = arith.constant 0 : index
    %c0_15 = arith.constant 0 : index
    %32 = vector.load %arg7[%c0_14, %c0_15] : memref<16x96xbf16, #tpu.memory_space<vmem>>, vector<16x96xbf16>
    tpu.vector_store %arg7[%c0_14, %c0_15], %31 {strides = array<i32>} : memref<16x96xbf16, #tpu.memory_space<vmem>>, vector<16x96xbf16>,
    return
  }
  func.func @transform_0(%arg0: i32, %arg1: i32) -> (i32, i32) {
    %c0_i32 = arith.constant 0 : i32
    %c0_i32_0 = arith.constant 0 : i32
    return %arg0, %c0_i32 : i32, i32
  }
  func.func @transform_1(%arg0: i32, %arg1: i32) -> (i32, i32) {
    %c0_i32 = arith.constant 0 : i32
    %c0_i32_0 = arith.constant 0 : i32
    %c0_i32_1 = arith.constant 0 : i32
    return %c0_i32, %c0_i32_0 : i32, i32
  }
  func.func @transform_2(%arg0: i32, %arg1: i32) -> (i32, i32) {
    %c0_i32 = arith.constant 0 : i32
    %c0_i32_0 = arith.constant 0 : i32
    %c0_i32_1 = arith.constant 0 : i32
    return %c0_i32, %c0_i32_0 : i32, i32
  }
  func.func @transform_3(%arg0: i32, %arg1: i32) -> (i32, i32) {
    %c0_i32 = arith.constant 0 : i32
    %c0_i32_0 = arith.constant 0 : i32
    return %c0_i32, %arg1 : i32, i32
  }
  func.func @transform_4(%arg0: i32, %arg1: i32) -> (i32, i32) {
    %c0_i32 = arith.constant 0 : i32
    %c0_i32_0 = arith.constant 0 : i32
    return %c0_i32, %arg1 : i32, i32
  }
  func.func @transform_5(%arg0: i32, %arg1: i32) -> (i32, i32) {
    %c0_i32 = arith.constant 0 : i32
    return %arg0, %arg1 : i32, i32
  }
}

</mosaic_0001>

<bundles_post_ra>
// kernel: tpu_custom_call.1
= control target key start
LH: loop header
LB: loop body
LE: loop exit
PB: predicated region body
PF: predicated region fallthrough
CT: control target
= control target key end

     0   :  { %10 = vsyncpa [#allocation3], 0  ;;  %s395_s0 = inlined_call_operand.hbm [shape: f32[16,32], index: 0, kind: input, shape index: {}]   ;;  %s396_s1 = inlined_call_operand.hbm [shape: f32[1,32], index: 1, kind: input, shape index: {}]   ;;  %s397_s2 = inlined_call_operand.vmem [shape: f32[1,32], index: 2, kind: input, shape index: {}]   ;;  %s398_s3 = inlined_call_operand.hbm [shape: bf16[32,96], index: 3, kind: input, shape index: {}]   ;;  %s399_s4 = inlined_call_operand.vmem [shape: f32[1,96], index: 4, kind: input, shape index: {}]   ;;  %s400_s5 = inlined_call_operand.hbm [shape: bf16[16,96], index: 5, kind: output, shape index: {}]  }
   0x1   :  { %11 = vsyncpa [#allocation6], 0  ;;  %s31_s20 = sshll.u32 %s396_s1, 4  ;;  %s32_s20 = int_to_ptr.hbm [resolvable:$true] %s31_s20 }
   0x2   :  { %12 = vsyncpa [#allocation4], 0  ;;  %s327_s21 = smov [#allocation5]   ;;  %s17_s25 = sshll.u32 %s395_s0, 4  ;;  %s18_s25 = int_to_ptr.hbm [resolvable:$true] %s17_s25 }
   0x3   :  { %s33_s22 = sshll.u32 %s327_s21, 4  ;;  %s328_s26 = smov [#allocation2]   ;;  %s34_s22 = int_to_ptr.vmem [resolvable:$true] %s33_s22 }
   0x4   :  { %36 = dma.hbm_to_vmem [thread:$0]  %s32_s20, 16, %s34_s22, [#allocation6]  }
   0x5   :  { %s19_s27 = sshll.u32 %s328_s26, 4  ;;  %s329_s28 = smov 128   ;;  %s20_s27 = int_to_ptr.vmem [resolvable:$true] %s19_s27 }
   0x6   :  { %s330_s29 = smov 8   ;;  %s43_s1 = sshll.u32 %s398_s3, 4  ;;  %s44_s1 = int_to_ptr.hbm [resolvable:$true] %s43_s1 }
   0x7   :  { %25 = dma.hbm_to_vmem [thread:$0]  %s18_s25, 256, %s20_s27, [#allocation3], %s329_s28, %s329_s28, %s330_s29  }
   0x8   :  { %s331_s7 = smov [#allocation7]   ;;  %s332_s9 = smov 64  }
   0x9   :  { %s45_s8 = sshll.u32 %s331_s7, 4  ;;  %s333_s10 = smov 4   ;;  %s46_s8 = int_to_ptr.vmem [resolvable:$true] %s45_s8 }
   0xa   :  { %51 = dma.hbm_to_vmem [thread:$0]  %s44_s1, 256, %s46_s8, [#allocation6], %s332_s9, %s332_s9, %s333_s10  }
   0xb   :  { %321 = dma.done.wait [#allocation3], 256  }
   0xc   :  { %322 = vsyncadd [#allocation3], 4294967040 }
   0xd   :  { %323 = dma.done.wait [#allocation6], 272  }
   0xe   :  { %324 = vsyncadd [#allocation6], 4294967024  ;;  %vm69_vm0 = vcmask 261120   ;;  %v67_v0 = vld [vmem:[#allocation2] sm:$0xff]  ;;  %v68_v2 = vld [vmem:[#allocation2 + $0x8] sm:$0xff]  ;;  %v334_v4 = vmov 32.0  }
   0xf   :  { %v70_v1 = vsel %vm69_vm0, %v67_v0, 0.0  ;;  %v73_v3 = vsel %vm69_vm0, %v68_v2, 0.0  ;;  %219 = vrcp.f32 %v334_v4  ;;  %v206_v21 = vld [vmem:[#allocation7 + $0x8] sm:$0xff]  ;;  %v205_v23 = vld [vmem:[#allocation7] sm:$0xff]  ;;  %v216_v42 = vld [vmem:[#allocation5] ss:$0 sm:$0xff] }
  0x10   :  { %71 = vadd.xlane.f32.xlu0 %v70_v1  ;;  %163 = vmatpush.bf16.msra.mxu0 %v206_v21  ;;  %v217_v47 = vld [vmem:[%s397_s2] ss:$0 sm:$0xff]  ;;  %vm173_vm8 = vcmask 781312   ;;  %s335_s13 = smov [#allocation8]   ;;  %s182_s16 = sshll.u32 %s400_s5, 4  ;;  %s183_s16 = int_to_ptr.hbm [resolvable:$true] %s182_s16 }
  0x11   :  { %v218_v52 = vld [vmem:[%s399_s4] ss:$0 sm:$0xff]  ;;  %s180_s14 = sshll.u32 %s335_s13, 4  ;;  %s181_s14 = int_to_ptr.vmem [resolvable:$true] %s180_s14 }
  0x14   :  { %164 = vmatpush.bf16.msra.mxu0 %v205_v23 }
  0x15   :  { %v220_v5 = vpop.eup %219 }
  0x16   :  { %v77_v6 = vmul.f32 32.0, %v220_v5  ;;  %vm81_vm1 = vweird.f32 %v220_v5 }
  0x18   :  { %74 = vadd.xlane.f32.xlu0 %v73_v3  ;;  %v78_v7 = vsub.f32 1.0, %v77_v6 }
  0x1a   :  { %v79_v8 = vmul.f32 %v220_v5, %v78_v7 }
  0x1c   :  { %v80_v9 = vadd.f32 %v220_v5, %v79_v8 }
  0x1e   :  { %v82_v10 = vsel %vm81_vm1, %v220_v5, %v80_v9 }
  0x83   :  { %v72_v11 = vpop.xlane.xlu0 %71 }
  0x84   :  { %v83_v12 = vmul.f32 %v82_v10, %v72_v11 }
  0x86   :  { %v85_v13 = vsub.f32 %v67_v0, %v83_v12 }
  0x88   :  { %v87_v14 = vmul.f32 %v85_v13, %v85_v13 }
  0x8a   :  { %v89_v15 = vsel %vm69_vm0, %v87_v14, 0.0 }
  0x8b   :  { %90 = vadd.xlane.f32.xlu1 %v89_v15  ;;  %v75_v16 = vpop.xlane.xlu0 %74 }
  0x8c   :  { %v84_v17 = vmul.f32 %v82_v10, %v75_v16 }
  0x8e   :  { %v86_v18 = vsub.f32 %v68_v2, %v84_v17 }
  0x90   :  { %v88_v19 = vmul.f32 %v86_v18, %v86_v18 }
  0x92   :  { %v92_v20 = vsel %vm69_vm0, %v88_v19, 0.0 }
  0x93   :  { %93 = vadd.xlane.f32.xlu1 %v92_v20 }
  0xfe   :  { %v91_v22 = vpop.xlane.xlu1 %90 }
  0xff   :  { %v95_v24 = vmul.f32 %v91_v22, %v82_v10 }
 0x101   :  { %v98_v25 = vadd.f32 1e-05, %v95_v24 }
 0x103   :  { %221 = vrsqrt.f32 %v98_v25  ;;  %vm106_vm3 = vweird.f32 %v98_v25 }
 0x106   :  { %v94_v26 = vpop.xlane.xlu1 %93 }
 0x107   :  { %v96_v27 = vmul.f32 %v94_v26, %v82_v10 }
 0x109   :  { %v222_v28 = vpop.eup %221  ;;  %v99_v29 = vadd.f32 1e-05, %v96_v27 }
 0x10a   :  { %v101_v30 = vmul.f32 %v222_v28, %v98_v25  ;;  %vm107_vm2 = vweird.f32 %v222_v28 }
 0x10b   :  { %223 = vrsqrt.f32 %v99_v29  ;;  %vm108_vm4 = vmor %vm106_vm3, %vm107_vm2  ;;  %vm116_vm6 = vweird.f32 %v99_v29 }
 0x10c   :  { %v102_v31 = vmul.f32 %v222_v28, %v101_v30 }
 0x10e   :  { %v103_v32 = vmul.f32 0.5, %v102_v31 }
 0x110   :  { %v104_v33 = vsub.f32 1.5, %v103_v32 }
 0x111   :  { %v224_v34 = vpop.eup %223 }
 0x112   :  { %v105_v35 = vmul.f32 %v222_v28, %v104_v33  ;;  %v111_v36 = vmul.f32 %v224_v34, %v99_v29  ;;  %vm117_vm5 = vweird.f32 %v224_v34 }
 0x113   :  { %vm118_vm7 = vmor %vm116_vm6, %vm117_vm5 }
 0x114   :  { %v112_v37 = vmul.f32 %v224_v34, %v111_v36  ;;  %v109_v38 = vsel %vm108_vm4, %v222_v28, %v105_v35 }
 0x115   :  { %v120_v41 = vmul.f32 %v109_v38, %v85_v13 }
 0x116   :  { %v113_v39 = vmul.f32 0.5, %v112_v37 }
 0x117   :  { %v125_v46 = vmul.f32 %v216_v42, %v120_v41 }
 0x118   :  { %v114_v40 = vsub.f32 1.5, %v113_v39 }
 0x119   :  { %v131_v49 = vadd.f32 %v217_v47, %v125_v46 }
 0x11a   :  { %v115_v43 = vmul.f32 %v224_v34, %v114_v40 }
 0x11c   :  { %v119_v44 = vsel %vm118_vm7, %v224_v34, %v115_v43 }
 0x11d   :  { %v121_v45 = vmul.f32 %v119_v44, %v86_v18 }
 0x11f   :  { %v126_v48 = vmul.f32 %v216_v42, %v121_v45 }
 0x121   :  { %v132_v50 = vadd.f32 %v217_v47, %v126_v48 }
 0x123   :  { %v133_v51 = vpack.c.bf16 %v132_v50, %v131_v49 }
 0x125   :  { %204 = vmatmul.msk.bf16.vlgmr.msra.gmra.mxu0 %vm69_vm0, %v133_v51 }
 0x1a2   :  { %v166_v53 = vpop.f32.mrf.mxu0 }
 0x1a3   :  { %v167_v54 = vadd.f32 %v218_v52, %v166_v53 }
 0x1a5   :  { %v171_v55 = vpack.c.bf16 %v167_v54, %v167_v54 }
 0x1a7   :  { %174 = vst.msk [vmem:[#allocation8] sm:$0xf] %vm173_vm8, %v171_v55 }
 0x1aa   :  { %v168_v56 = vpop.f32.mrf.mxu0 }
 0x1ab   :  { %v169_v57 = vadd.f32 %v218_v52, %v168_v56 }
 0x1ad   :  { %v172_v58 = vpack.c.bf16 %v169_v57, %v169_v57 }
 0x1af   :  { %175 = vst.msk [vmem:[#allocation8 + $0x4] sm:$0xf] %vm173_vm8, %v172_v58 }
 0x1b0   :  { %188 = dma.vmem_to_hbm [thread:$0]  %s181_s14, 128, %s183_s16, [#allocation4], %s332_s9, %s332_s9, %s333_s10  }
 0x1b1   :  { %325 = dma.done.wait [#allocation4], 128  }
 0x1b2   :  { %326 = vsyncadd [#allocation4], 4294967168 }
 0x1b3   :  { %193 = vsyncpa [#allocation3], 1 }
 0x1b4   :  { %194 = vsyncpa [#allocation6], 1 }
 0x1b5   :  { %195 = vsyncpa [#allocation4], 1 }

</bundles_post_ra>
